<compile_context>
chip_gen: v7x
topology: tpu7x:2x2x1
jax: 0.10.0
libtpu: 0.0.40
codegen_flags: <defaults>
</compile_context>

<pallas_src>
import functools
import math

import jax
import jax.numpy as jnp
from jax.experimental import pallas as pl
from jax.experimental.pallas import tpu as pltpu

USE_CLAMP = True
SOFT_ROUND_TEMPERATURE = 0.3
KUMARASWAMY_PARAM = 2.0

LANE = 128
SUBLANE = 8
MAX_BLOCK_ROWS = 2048          # 2048 x 128 x 4B = 1 MiB per f32 block


def _softround(x, inv_t, half_over_tanh):
    # softround(x, t) with 1/t and 0.5/tanh(1/(2t)) folded to Python constants
    fl = jnp.floor(x)
    return fl + half_over_tanh * jnp.tanh((x - fl - 0.5) * inv_t) + 0.5


# -------------------- kernel 1: global sum (for input_mean) --------------------
def _sum_kernel(x_ref, o_ref):
    @pl.when(pl.program_id(0) == 0)
    def _():
        o_ref[...] = jnp.zeros_like(o_ref)

    o_ref[...] += jnp.sum(x_ref[...].astype(jnp.float32)).reshape(1, 1)


def _pallas_sum(x2d, block_rows):
    rows, cols = x2d.shape
    return pl.pallas_call(
        _sum_kernel,
        out_shape=jax.ShapeDtypeStruct((1, 1), jnp.float32),
        grid=(rows // block_rows,),
        in_specs=[pl.BlockSpec((block_rows, cols), lambda i: (i, 0))],
        out_specs=pl.BlockSpec((1, 1), lambda i: (0, 0)),
        compiler_params=pltpu.CompilerParams(
            dimension_semantics=("arbitrary",),        # resident accumulator
            vmem_limit_bytes=32 * 1024 * 1024),
    )(x2d)


# -------------------- kernel 2: noise quantizer (elementwise hot path) ----------
def _quantizer_kernel(params_ref, x_ref, u_ref, o_ref, *,
                      inv_t, half_over_tanh, inv_a, inv_b, a_is_two, use_clamp):
    # params_ref (SMEM, f32): [q, 1/q, clamp_lo, clamp_hi]
    x = x_ref[...].astype(jnp.float32)

    if use_clamp:
        # x/Q clamped to mean/Q +- 15000 ; divide replaced by scalar-recip mul
        x = jnp.clip(x * params_ref[1], params_ref[2], params_ref[3])

    # kumaraswamy noise in [-0.5, 0.5]; u and (1-u) have the same distribution,
    # so use u directly.  Clamp the inner term to >= 0 so the outer root never
    # sees a negative ulp from the pow rounding above 1.
    u = u_ref[...]
    inner = jnp.maximum(1.0 - jnp.power(u, inv_b), 0.0)
    if a_is_two:
        noise = jnp.sqrt(inner) - 0.5          # a == 2 specialization: 1 EUP op
    else:
        noise = jnp.power(inner, inv_a) - 0.5
    y = _softround(_softround(x, inv_t, half_over_tanh) + noise,
                   inv_t, half_over_tanh)
    o_ref[...] = (y * params_ref[0]).astype(o_ref.dtype)


def kumaraswamy_noise_quantize(x, Q, key=None, seed=0, input_mean=None,
                               soft_round_temperature=SOFT_ROUND_TEMPERATURE,
                               kumaraswamy_param=KUMARASWAMY_PARAM):
    """JAX/Pallas equivalent of KumaraswamyNoiseQuantizer.forward(x, Q, input_mean).

    x : floating-point array of any shape (e.g. NCHW).  Q : scalar.
    Returns an array with the same shape/dtype as x.
    """
    orig_shape = x.shape
    orig_dtype = x.dtype
    if not jnp.issubdtype(orig_dtype, jnp.floating):
        raise ValueError("kumaraswamy_noise_quantize only supports floating dtypes")
    n = x.size

    # lane-dense (rows, 128) view; rows padded up to a multiple of block_rows
    # so the block size never degrades for awkward sizes.
    chunk = SUBLANE * LANE
    rows = ((n + chunk - 1) // chunk) * SUBLANE
    block_rows = min(rows, MAX_BLOCK_ROWS)
    rows = ((rows + block_rows - 1) // block_rows) * block_rows
    n_pad = rows * LANE

    xf = x.reshape(-1)                       # keep native dtype (no f32 round-trip)
    if n_pad != n:
        xf = jnp.pad(xf, (0, n_pad - n))     # zero padding; sum unaffected
    x2d = xf.reshape(rows, LANE)

    if input_mean is None:
        input_mean = _pallas_sum(x2d, block_rows)[0, 0] / jnp.float32(n)
    mean = jnp.asarray(input_mean, jnp.float32)

    # TODO(synk): tensor-valued Q with broadcasting not supported; scalar Q only.
    q = jnp.asarray(Q, jnp.float32).reshape(-1)[0]
    inv_q = 1.0 / q
    lo = mean * inv_q - 15000.0
    hi = mean * inv_q + 15000.0
    params = jnp.stack([q, inv_q, lo, hi])

    # host-side uniform [0, 1) noise (torch.rand_like equivalent)
    if key is None:
        key = jax.random.PRNGKey(seed)
    u2d = jax.random.uniform(key, (rows, LANE), jnp.float32)

    t = float(soft_round_temperature)
    a = float(kumaraswamy_param)
    b = (2.0 ** a * (a - 1.0) + 1.0) / a
    kernel = functools.partial(
        _quantizer_kernel,
        inv_t=1.0 / t,
        half_over_tanh=0.5 / math.tanh(1.0 / (2.0 * t)),
        inv_a=1.0 / a,
        inv_b=1.0 / b,
        a_is_two=(a == 2.0),
        use_clamp=USE_CLAMP,
    )

    grid_spec = pltpu.PrefetchScalarGridSpec(
        num_scalar_prefetch=1,
        grid=(rows // block_rows,),
        in_specs=[pl.BlockSpec((block_rows, LANE), lambda i, p: (i, 0)),
                  pl.BlockSpec((block_rows, LANE), lambda i, p: (i, 0))],
        out_specs=pl.BlockSpec((block_rows, LANE), lambda i, p: (i, 0)),
    )

    bytes_accessed = (x2d.size * x2d.dtype.itemsize
                      + u2d.size * u2d.dtype.itemsize
                      + rows * LANE * jnp.dtype(orig_dtype).itemsize)
    y2d = pl.pallas_call(
        kernel,
        out_shape=jax.ShapeDtypeStruct((rows, LANE), orig_dtype),
        grid_spec=grid_spec,
        compiler_params=pltpu.CompilerParams(
            dimension_semantics=("parallel",),          # independent tiles
            vmem_limit_bytes=32 * 1024 * 1024),
        cost_estimate=pl.CostEstimate(
            flops=20 * n, transcendentals=4 * n, bytes_accessed=bytes_accessed),
    )(params, x2d, u2d)

    if n_pad != n:
        return y2d.reshape(-1)[:n].reshape(orig_shape)
    return y2d.reshape(orig_shape)


if __name__ == "__main__":
    key = jax.random.PRNGKey(0)
    kx, kn = jax.random.split(key)
    x = jax.random.normal(kx, (2, 4, 16, 16), jnp.float32) * 3.0  # NCHW
    Q = 0.5

    y = kumaraswamy_noise_quantize(x, Q, key=kn)
    y = jax.block_until_ready(y)

    assert y.shape == x.shape and y.dtype == x.dtype
    assert bool(jnp.all(jnp.isfinite(y)))
    # quantized values stay within soft-round + noise distance of x (scaled by Q)
    assert bool(jnp.max(jnp.abs(y - x)) < 2.0 * Q + 1.0)
    print("KERNEL_OK")
</pallas_src>

<mosaic_0001>
module attributes {stable_mosaic.version = 11 : i64} {
  func.func @_sum_kernel(%arg0: i32, %arg1: memref<16x128xf32, #tpu.memory_space<vmem>>, %arg2: memref<1x1xf32, #tpu.memory_space<vmem>>) attributes {dimension_semantics = [#tpu.dimension_semantics<arbitrary>], iteration_bounds = array<i64: 1>, scalar_prefetch = 0 : i64, scratch_operands = 0 : i64, tpu.core_type = #tpu.core_type<tc>, window_params = [{transform_indices = @transform_0, window_bounds = array<i64: 16, 128>}, {pipeline_mode = #tpu.pipeline_mode<synchronous>, transform_indices = @transform_1, window_bounds = array<i64: 1, 1>}]} {
    %c0_i32 = arith.constant 0 : i32
    %0 = arith.cmpi eq, %arg0, %c0_i32 : i32
    %1 = arith.extui %0 : i1 to i32
    %c0_i32_0 = arith.constant 0 : i32
    %2 = arith.cmpi ne, %1, %c0_i32_0 : i32
    scf.if %2 {
      %cst_6 = arith.constant 0.000000e+00 : f32
      %12 = vector.broadcast %cst_6 : f32 to vector<1x1xf32>
      %c0_7 = arith.constant 0 : index
      %c0_8 = arith.constant 0 : index
      %13 = vector.load %arg2[%c0_7, %c0_8] : memref<1x1xf32, #tpu.memory_space<vmem>>, vector<1x1xf32>
      tpu.vector_store %arg2[%c0_7, %c0_8], %12 {strides = array<i32>} : memref<1x1xf32, #tpu.memory_space<vmem>>, vector<1x1xf32>,
    } else {
    }
    %c0 = arith.constant 0 : index
    %c0_1 = arith.constant 0 : index
    %3 = vector.load %arg2[%c0, %c0_1] : memref<1x1xf32, #tpu.memory_space<vmem>>, vector<1x1xf32>
    %c0_2 = arith.constant 0 : index
    %c0_3 = arith.constant 0 : index
    %4 = vector.load %arg1[%c0_2, %c0_3] : memref<16x128xf32, #tpu.memory_space<vmem>>, vector<16x128xf32>
    %5 = vector.shape_cast %4 : vector<16x128xf32> to vector<1x16x128xf32>
    %cst = arith.constant dense<0.000000e+00> : vector<1xf32>
    %6 = vector.multi_reduction <add>, %5, %cst [1, 2] : vector<1x16x128xf32> to vector<1xf32>
    %7 = vector.shape_cast %6 : vector<1xf32> to vector<1x1x1xf32>
    %8 = vector.extract %7[0, 0, 0] : f32 from vector<1x1x1xf32>
    %9 = vector.broadcast %8 : f32 to vector<1x1xf32>
    %10 = arith.addf %3, %9 : vector<1x1xf32>
    %c0_4 = arith.constant 0 : index
    %c0_5 = arith.constant 0 : index
    %11 = vector.load %arg2[%c0_4, %c0_5] : memref<1x1xf32, #tpu.memory_space<vmem>>, vector<1x1xf32>
    tpu.vector_store %arg2[%c0_4, %c0_5], %10 {strides = array<i32>} : memref<1x1xf32, #tpu.memory_space<vmem>>, vector<1x1xf32>,
    return
  }
  func.func @transform_0(%arg0: i32) -> (i32, i32) {
    %c0_i32 = arith.constant 0 : i32
    %c0_i32_0 = arith.constant 0 : i32
    return %arg0, %c0_i32 : i32, i32
  }
  func.func @transform_1(%arg0: i32) -> (i32, i32) {
    %c0_i32 = arith.constant 0 : i32
    %c0_i32_0 = arith.constant 0 : i32
    %c0_i32_1 = arith.constant 0 : i32
    return %c0_i32, %c0_i32_0 : i32, i32
  }
}

</mosaic_0001>

<bundles_post_ra>
// kernel: tpu_custom_call.1
= control target key start
LH: loop header
LB: loop body
LE: loop exit
PB: predicated region body
PF: predicated region fallthrough
CT: control target
= control target key end

     0   :  { %6 = vsyncpa [#allocation3], 0  ;;  %s157_s0 = inlined_call_operand.hbm [shape: f32[16,128], index: 0, kind: input, shape index: {}]   ;;  %s158_s1 = inlined_call_operand.hbm [shape: f32[1,1], index: 1, kind: output, shape index: {}]  }
   0x1   :  { %7 = vsyncpa [#allocation4], 0  ;;  %s116_s6 = smov [#allocation2]   ;;  %s68_s10 = scalar_lea.hbm %s157_s0, 256 }
   0x2   :  { %s13_s7 = sshll.u32 %s116_s6, 4  ;;  %p69_p0 = scmp.ne.s32.totalorder %s157_s0, %s68_s10  ;;  %s14_s7 = int_to_ptr.vmem [resolvable:$true] %s13_s7 }
   0x3   :  { %p72_p1 = scmp.lt.u32.totalorder %s68_s10, %s157_s0 }
   0x5   :  { %p74_p2 = pnand %p72_p1, %p69_p0 }
   0x7   :  { %77 = shalt.err (!%p74_p2)
}
   0x8   :  { %s78_s15 = scalar_lea.vmem %s14_s7, 256  ;;  %p83_p4 = scmp.lt.s32.totalorder %s14_s7, %s14_s7 }
   0x9   :  { %p79_p3 = scmp.ne.s32.totalorder %s14_s7, %s78_s15  ;;  %p84_p5 = scmp.lt.s32.totalorder %s78_s15, %s78_s15 }
   0xb   :  { %p85_p6 = por %p84_p5, %p83_p4 }
   0xd   :  { %p86_p7 = pnand %p85_p6, %p79_p3 }
   0xf   :  { %89 = shalt.err (!%p86_p7)
}
  0x10   :  { %s117_s16 = smov 128   ;;  %s118_s17 = smov 8  }
  0x11   :  { %19 = dma.hbm_to_vmem [thread:$0]  %s157_s0, 256, %s14_s7, [#allocation3], %s117_s16, %s117_s16, %s118_s17  }
  0x12   :  { %112 = dma.done.wait [#allocation3], 256  }
  0x13   :  { %113 = vsyncadd [#allocation3], 4294967040  ;;  %vm27_vm0 = vcmask 0   ;;  %v119_v0 = vmov 0.0   ;;  %v30_v1 = vld [vmem:[#allocation2] sm:$0xff]  ;;  %v31_v2 = vld [vmem:[#allocation2 + $0x8] sm:$0xff] }
  0x14   :  { %28 = vst.msk [vmem:[#allocation5] sm:$0x1] %vm27_vm0, %v119_v0  ;;  %v32_v3 = vadd.f32 %v31_v2, %v30_v1  ;;  %s120_s0 = smov [#allocation5]  }
  0x15   :  { %s52_s20 = sshll.u32 %s120_s0, 4  ;;  %s53_s20 = int_to_ptr.vmem [resolvable:$true] %s52_s20 }
  0x16   :  { %33 = vadd.xlane.f32.xlu0 %v32_v3  ;;  %s90_s22 = scalar_lea.vmem %s53_s20, 16  ;;  %s94_s23 = scalar_lea.vmem %s53_s20, 32 }
  0x17   :  { %p91_p8 = scmp.ne.s32.totalorder %s53_s20, %s90_s22  ;;  %p95_p9 = scmp.lt.s32.totalorder %s53_s20, %s53_s20 }
  0x18   :  { %p96_p10 = scmp.lt.s32.totalorder %s94_s23, %s90_s22 }
  0x1a   :  { %p97_p11 = por %p96_p10, %p95_p9 }
  0x1b   :  { %v29_v11 = vld [vmem:[#allocation5] sm:$0x1] }
  0x1c   :  { %p98_p12 = pnand %p97_p11, %p91_p8 }
  0xa3   :  { %v34_v4 = vpop.xlane.xlu0 %33 }
  0xa4   :  { %v35_v5 = vrot.slane %v34_v4, 4 }
  0xa6   :  { %v36_v6 = vadd.f32 %v35_v5, %v34_v4 }
  0xa8   :  { %v37_v7 = vrot.slane %v36_v6, 2 }
  0xaa   :  { %v38_v8 = vadd.f32 %v37_v7, %v36_v6 }
  0xac   :  { %v39_v9 = vrot.slane %v38_v8, 1 }
  0xae   :  { %v40_v10 = vadd.f32 %v39_v9, %v38_v8 }
  0xb0   :  { %61 = vpush %v40_v10 }
  0xe1   :  { %s62_s21 = spop %61 }
  0xe2   :  { %v42_v12 = vstv %s62_s21 }
  0xe3   :  { %v43_v13 = vadd.f32 %v42_v12, %v29_v11 }
  0xe5   :  { %45 = vst.msk [vmem:[#allocation5] sm:$0x1] %vm27_vm0, %v43_v13 }
  0xe6   :  { %101 = shalt.err (!%p98_p12)
}
  0xe7   :  { %s102_s26 = scalar_lea.hbm %s158_s1, 16 }
  0xe8   :  { %p103_p13 = scmp.ne.s32.totalorder %s158_s1, %s102_s26  ;;  %p106_p0 = scmp.lt.u32.totalorder %s102_s26, %s158_s1 }
  0xea   :  { %p108_p1 = pnand %p106_p0, %p103_p13 }
  0xec   :  { %111 = shalt.err (!%p108_p1)
}
  0xed   :  { %55 = dma.vmem_to_hbm [thread:$0]  %s53_s20, 16, %s158_s1, [#allocation4]  }
  0xee   :  { %114 = dma.done.wait [#allocation4], 16  }
  0xef   :  { %115 = vsyncadd [#allocation4], 4294967280 }
  0xf0   :  { %59 = vsyncpa [#allocation3], 1 }
  0xf1   :  { %60 = vsyncpa [#allocation4], 1 }

</bundles_post_ra>
